<compile_context>
chip_gen: v7x
topology: tpu7x:2x2x1
jax: 0.10.0
libtpu: 0.0.40
codegen_flags: <defaults>
</compile_context>

<pallas_src>
import functools
import math

import jax
import jax.numpy as jnp
from jax.experimental import pallas as pl
from jax.experimental.pallas import tpu as pltpu

LANE = 128      # MXU / lane width: matmul N dims padded to this
SUBLANE = 8     # f32 sublane packing: batch tile kept a multiple of 8


def _round_up(x, m):
    return (x + m - 1) // m * m


# ---------------------------------------------------------------------------
# Kernel: one batch tile of the fused 3-layer MLP
# ---------------------------------------------------------------------------
def actor_kernel(x_ref, w1_ref, b1_ref, w2_ref, b2_ref, w3_ref, b3_ref,
                 o_ref, *, max_action, action_dim):
    wdt = w1_ref.dtype                      # bf16 (default) or f32 MXU input
    x = x_ref[...]

    # MXU matmuls in the weight dtype with f32 accumulation; all elementwise
    # math (bias, ReLU, tanh, scaling) stays f32 on the VPU/EUP (v5e-safe).
    h1 = jnp.dot(x.astype(wdt), w1_ref[...],
                 preferred_element_type=jnp.float32) + b1_ref[...]
    h1 = jnp.maximum(h1, 0.0)

    h2 = jnp.dot(h1.astype(wdt), w2_ref[...],
                 preferred_element_type=jnp.float32) + b2_ref[...]
    h2 = jnp.maximum(h2, 0.0)

    a = jnp.dot(h2.astype(wdt), w3_ref[...],
                preferred_element_type=jnp.float32) + b3_ref[...]

    # Only the real action columns reach HBM: static slice off the 128-lane
    # MXU padding before tanh, then a narrow (tb, action_dim) store.
    o_ref[...] = (jnp.tanh(a[:, :action_dim]) * max_action).astype(o_ref.dtype)


# ---------------------------------------------------------------------------
# Host wrapper
# ---------------------------------------------------------------------------
def actor_forward(state, kparams, max_action, *, block_b=2048, min_grid_steps=2):
    """state: (B, state_dim) f32.  kparams: output of prepare_kernel_params."""
    w1, b1 = kparams["w1"], kparams["b1"]
    w2, b2 = kparams["w2"], kparams["b2"]
    w3, b3 = kparams["w3"], kparams["b3"]
    action_dim = kparams["action_dim"]

    B, state_dim = state.shape
    block_b = max(SUBLANE, _round_up(block_b, SUBLANE))

    # Batch tile: large enough to amortize the ~0.35us/step pipeline overhead,
    # small enough that the grid has >= min_grid_steps steps so the "parallel"
    # axis feeds both v7x TensorCores.  No batch padding at all: the ragged
    # last block is handled by Pallas (OOB input rows are compute-only garbage,
    # OOB output rows are dropped on store).
    tb = min(block_b,
             max(SUBLANE, _round_up(pl.cdiv(B, min_grid_steps), SUBLANE)))
    grid = (pl.cdiv(B, tb),)

    kernel = functools.partial(actor_kernel, max_action=float(max_action),
                               action_dim=action_dim)

    def call(weight_pipeline_mode):
        const_kw = ({} if weight_pipeline_mode is None
                    else {"pipeline_mode": weight_pipeline_mode})
        in_specs = [
            # Batch tile streams with the grid (auto double-buffered DMA).
            pl.BlockSpec((tb, state_dim), lambda i: (i, 0)),
            # Weights / biases: constant index map -> stay resident in VMEM.
            pl.BlockSpec(w1.shape, lambda i: (0, 0), **const_kw),
            pl.BlockSpec(b1.shape, lambda i: (0, 0), **const_kw),
            pl.BlockSpec(w2.shape, lambda i: (0, 0), **const_kw),
            pl.BlockSpec(b2.shape, lambda i: (0, 0), **const_kw),
            pl.BlockSpec(w3.shape, lambda i: (0, 0), **const_kw),
            pl.BlockSpec(b3.shape, lambda i: (0, 0), **const_kw),
        ]
        return pl.pallas_call(
            kernel,
            out_shape=jax.ShapeDtypeStruct((B, action_dim), jnp.float32),
            grid=grid,
            in_specs=in_specs,
            out_specs=pl.BlockSpec((tb, action_dim), lambda i: (i, 0)),
            compiler_params=pltpu.CompilerParams(
                dimension_semantics=("parallel",),   # megacore batch split (v7x)
            ),
        )(state, w1, b1, w2, b2, w3, b3)

    try:
        # Constant blocks never change: one VMEM buffer is enough.
        return call(pl.Buffered(1))
    except Exception:
        # Fallback for jax versions that reject Buffered(1) on pallas_call.
        return call(None)


# ---------------------------------------------------------------------------
# Parameter construction (matches the PyTorch module's init)
# ---------------------------------------------------------------------------
def make_actor_params(key, state_dim, action_dim, hidden_dim=400):
    """Raw f32 params. Weights stored (in_features, out_features) = W.T of nn.Linear."""
    h1, h2 = hidden_dim, hidden_dim // 2
    k = jax.random.split(key, 6)

    def xavier(kk, fi, fo):
        # nn.init.xavier_uniform_ (gain=1): U(-a, a), a = sqrt(6/(fan_in+fan_out))
        a = math.sqrt(6.0 / (fi + fo))
        return jax.random.uniform(kk, (fi, fo), jnp.float32, -a, a)

    def bias(kk, fi, fo):
        # nn.Linear default bias init: U(-1/sqrt(fan_in), 1/sqrt(fan_in))
        b = 1.0 / math.sqrt(fi)
        return jax.random.uniform(kk, (fo,), jnp.float32, -b, b)

    return {
        "w1": xavier(k[0], state_dim, h1),  "b1": bias(k[1], state_dim, h1),
        "w2": xavier(k[2], h1, h2),         "b2": bias(k[3], h1, h2),
        "w3": xavier(k[4], h2, action_dim), "b3": bias(k[5], h2, action_dim),
        "action_dim": action_dim,
    }


def prepare_kernel_params(raw, weight_dtype=jnp.bfloat16):
    """Pad hidden/output feature dims to multiples of 128 lanes (MXU-aligned)
    and cast weights to `weight_dtype` (bf16 by default: MXU-native on
    v6e/v7x, fine on v5e's MXU).  Biases stay f32 and are shaped (1, out) for
    in-kernel broadcasting.  Zero padding is mathematically inert
    (relu(0)=0); the padded action lanes never leave the kernel because the
    output store is narrowed to the real action_dim."""
    def pad_cols(w, to):
        return jnp.pad(w, ((0, 0), (0, to - w.shape[1])))

    def pad_rows(w, to):
        return jnp.pad(w, ((0, to - w.shape[0]), (0, 0)))

    w1, w2, w3 = raw["w1"], raw["w2"], raw["w3"]
    b1, b2, b3 = raw["b1"], raw["b2"], raw["b3"]

    h1p = _round_up(w1.shape[1], LANE)
    h2p = _round_up(w2.shape[1], LANE)
    aop = _round_up(w3.shape[1], LANE)

    w1p = pad_cols(w1, h1p)
    w2p = pad_cols(pad_rows(w2, h1p), h2p)
    w3p = pad_cols(pad_rows(w3, h2p), aop)

    return {
        "w1": w1p.astype(weight_dtype),
        "b1": jnp.pad(b1, (0, h1p - b1.shape[0])).reshape(1, h1p).astype(jnp.float32),
        "w2": w2p.astype(weight_dtype),
        "b2": jnp.pad(b2, (0, h2p - b2.shape[0])).reshape(1, h2p).astype(jnp.float32),
        "w3": w3p.astype(weight_dtype),
        "b3": jnp.pad(b3, (0, aop - b3.shape[0])).reshape(1, aop).astype(jnp.float32),
        "action_dim": raw["action_dim"],
    }


if __name__ == "__main__":
    # Small, module-consistent shapes
    state_dim = 16
    action_dim = 4
    hidden_dim = 32          # hidden_dim // 2 = 16
    max_action = 2.0

    key = jax.random.PRNGKey(0)
    key_params, key_s1, key_s2 = jax.random.split(key, 3)
    raw = make_actor_params(key_params, state_dim, action_dim, hidden_dim)

    def reference(x):
        h = jnp.maximum(x @ raw["w1"] + raw["b1"], 0.0)
        h = jnp.maximum(h @ raw["w2"] + raw["b2"], 0.0)
        return jnp.tanh(h @ raw["w3"] + raw["b3"]) * max_action

    kp_f32 = prepare_kernel_params(raw, weight_dtype=jnp.float32)
    kp_bf16 = prepare_kernel_params(raw)                      # bf16 default

    # Small batch (single ragged block, B=2 < sublane tile of 8).
    state = jax.random.normal(key_s1, (2, state_dim), jnp.float32)
    out_f32 = jax.block_until_ready(actor_forward(state, kp_f32, max_action))
    assert out_f32.shape == (2, action_dim)
    assert jnp.allclose(out_f32, reference(state), atol=1e-4, rtol=1e-4)

    out_bf16 = jax.block_until_ready(actor_forward(state, kp_bf16, max_action))
    assert out_bf16.shape == (2, action_dim)
    assert jnp.allclose(out_bf16, reference(state), atol=1e-1, rtol=1e-1)

    # Multi-step grid + ragged last block (B=20 -> tb=16, grid=(2,)).
    state20 = jax.random.normal(key_s2, (20, state_dim), jnp.float32)
    out20 = jax.block_until_ready(actor_forward(state20, kp_f32, max_action))
    assert out20.shape == (20, action_dim)
    assert jnp.allclose(out20, reference(state20), atol=1e-4, rtol=1e-4)

    print("KERNEL_OK")
</pallas_src>

<mosaic_0001>
module attributes {stable_mosaic.version = 11 : i64} {
  func.func @actor_kernel(%arg0: i32, %arg1: memref<8x16xf32, #tpu.memory_space<vmem>>, %arg2: memref<16x128xf32, #tpu.memory_space<vmem>>, %arg3: memref<1x128xf32, #tpu.memory_space<vmem>>, %arg4: memref<128x128xf32, #tpu.memory_space<vmem>>, %arg5: memref<1x128xf32, #tpu.memory_space<vmem>>, %arg6: memref<128x128xf32, #tpu.memory_space<vmem>>, %arg7: memref<1x128xf32, #tpu.memory_space<vmem>>, %arg8: memref<8x4xf32, #tpu.memory_space<vmem>>) attributes {dimension_semantics = [#tpu.dimension_semantics<parallel>], iteration_bounds = array<i64: 1>, scalar_prefetch = 0 : i64, scratch_operands = 0 : i64, tpu.core_type = #tpu.core_type<tc>, window_params = [{transform_indices = @transform_0, window_bounds = array<i64: 8, 16>}, {pipeline_mode = #tpu.pipeline_mode<synchronous>, transform_indices = @transform_1, window_bounds = array<i64: 16, 128>}, {pipeline_mode = #tpu.pipeline_mode<synchronous>, transform_indices = @transform_2, window_bounds = array<i64: 1, 128>}, {pipeline_mode = #tpu.pipeline_mode<synchronous>, transform_indices = @transform_3, window_bounds = array<i64: 128, 128>}, {pipeline_mode = #tpu.pipeline_mode<synchronous>, transform_indices = @transform_4, window_bounds = array<i64: 1, 128>}, {pipeline_mode = #tpu.pipeline_mode<synchronous>, transform_indices = @transform_5, window_bounds = array<i64: 128, 128>}, {pipeline_mode = #tpu.pipeline_mode<synchronous>, transform_indices = @transform_6, window_bounds = array<i64: 1, 128>}, {transform_indices = @transform_7, window_bounds = array<i64: 8, 4>}]} {
    %c0 = arith.constant 0 : index
    %c0_0 = arith.constant 0 : index
    %0 = vector.load %arg1[%c0, %c0_0] : memref<8x16xf32, #tpu.memory_space<vmem>>, vector<8x16xf32>
    %c0_1 = arith.constant 0 : index
    %c0_2 = arith.constant 0 : index
    %1 = vector.load %arg2[%c0_1, %c0_2] : memref<16x128xf32, #tpu.memory_space<vmem>>, vector<16x128xf32>
    %cst = arith.constant dense<0.000000e+00> : vector<8x128xf32>
    %2 = tpu.matmul %0, %1, %cst {dimension_numbers = #tpu.dot_dimension_numbers<[1], [0], [0], [1], [0, 0, 1, 1], [], []>} : vector<8x16xf32>, vector<16x128xf32>, vector<8x128xf32> -> vector<8x128xf32>
    %c0_3 = arith.constant 0 : index
    %c0_4 = arith.constant 0 : index
    %3 = vector.load %arg3[%c0_3, %c0_4] : memref<1x128xf32, #tpu.memory_space<vmem>>, vector<1x128xf32>
    %4 = vector.broadcast %3 : vector<1x128xf32> to vector<8x128xf32>
    %5 = arith.addf %2, %4 : vector<8x128xf32>
    %cst_5 = arith.constant 0.000000e+00 : f32
    %6 = vector.broadcast %cst_5 : f32 to vector<8x128xf32>
    %7 = arith.maximumf %5, %6 : vector<8x128xf32>
    %c0_6 = arith.constant 0 : index
    %c0_7 = arith.constant 0 : index
    %8 = vector.load %arg4[%c0_6, %c0_7] : memref<128x128xf32, #tpu.memory_space<vmem>>, vector<128x128xf32>
    %cst_8 = arith.constant dense<0.000000e+00> : vector<8x128xf32>
    %9 = tpu.matmul %7, %8, %cst_8 {dimension_numbers = #tpu.dot_dimension_numbers<[1], [0], [0], [1], [0, 0, 1, 1], [], []>} : vector<8x128xf32>, vector<128x128xf32>, vector<8x128xf32> -> vector<8x128xf32>
    %c0_9 = arith.constant 0 : index
    %c0_10 = arith.constant 0 : index
    %10 = vector.load %arg5[%c0_9, %c0_10] : memref<1x128xf32, #tpu.memory_space<vmem>>, vector<1x128xf32>
    %11 = vector.broadcast %10 : vector<1x128xf32> to vector<8x128xf32>
    %12 = arith.addf %9, %11 : vector<8x128xf32>
    %cst_11 = arith.constant 0.000000e+00 : f32
    %13 = vector.broadcast %cst_11 : f32 to vector<8x128xf32>
    %14 = arith.maximumf %12, %13 : vector<8x128xf32>
    %c0_12 = arith.constant 0 : index
    %c0_13 = arith.constant 0 : index
    %15 = vector.load %arg6[%c0_12, %c0_13] : memref<128x128xf32, #tpu.memory_space<vmem>>, vector<128x128xf32>
    %cst_14 = arith.constant dense<0.000000e+00> : vector<8x128xf32>
    %16 = tpu.matmul %14, %15, %cst_14 {dimension_numbers = #tpu.dot_dimension_numbers<[1], [0], [0], [1], [0, 0, 1, 1], [], []>} : vector<8x128xf32>, vector<128x128xf32>, vector<8x128xf32> -> vector<8x128xf32>
    %c0_15 = arith.constant 0 : index
    %c0_16 = arith.constant 0 : index
    %17 = vector.load %arg7[%c0_15, %c0_16] : memref<1x128xf32, #tpu.memory_space<vmem>>, vector<1x128xf32>
    %18 = vector.broadcast %17 : vector<1x128xf32> to vector<8x128xf32>
    %19 = arith.addf %16, %18 : vector<8x128xf32>
    %20 = vector.extract_strided_slice %19 {offsets = [0, 0], sizes = [8, 4], strides = [1, 1]} : vector<8x128xf32> to vector<8x4xf32>
    %21 = math.tanh %20 : vector<8x4xf32>
    %cst_17 = arith.constant 2.000000e+00 : f32
    %22 = vector.broadcast %cst_17 : f32 to vector<8x4xf32>
    %23 = arith.mulf %21, %22 : vector<8x4xf32>
    %c0_18 = arith.constant 0 : index
    %c0_19 = arith.constant 0 : index
    %24 = vector.load %arg8[%c0_18, %c0_19] : memref<8x4xf32, #tpu.memory_space<vmem>>, vector<8x4xf32>
    tpu.vector_store %arg8[%c0_18, %c0_19], %23 {strides = array<i32>} : memref<8x4xf32, #tpu.memory_space<vmem>>, vector<8x4xf32>,
    return
  }
  func.func @transform_0(%arg0: i32) -> (i32, i32) {
    %c0_i32 = arith.constant 0 : i32
    %c0_i32_0 = arith.constant 0 : i32
    return %arg0, %c0_i32 : i32, i32
  }
  func.func @transform_1(%arg0: i32) -> (i32, i32) {
    %c0_i32 = arith.constant 0 : i32
    %c0_i32_0 = arith.constant 0 : i32
    %c0_i32_1 = arith.constant 0 : i32
    return %c0_i32, %c0_i32_0 : i32, i32
  }
  func.func @transform_2(%arg0: i32) -> (i32, i32) {
    %c0_i32 = arith.constant 0 : i32
    %c0_i32_0 = arith.constant 0 : i32
    %c0_i32_1 = arith.constant 0 : i32
    return %c0_i32, %c0_i32_0 : i32, i32
  }
  func.func @transform_3(%arg0: i32) -> (i32, i32) {
    %c0_i32 = arith.constant 0 : i32
    %c0_i32_0 = arith.constant 0 : i32
    %c0_i32_1 = arith.constant 0 : i32
    return %c0_i32, %c0_i32_0 : i32, i32
  }
  func.func @transform_4(%arg0: i32) -> (i32, i32) {
    %c0_i32 = arith.constant 0 : i32
    %c0_i32_0 = arith.constant 0 : i32
    %c0_i32_1 = arith.constant 0 : i32
    return %c0_i32, %c0_i32_0 : i32, i32
  }
  func.func @transform_5(%arg0: i32) -> (i32, i32) {
    %c0_i32 = arith.constant 0 : i32
    %c0_i32_0 = arith.constant 0 : i32
    %c0_i32_1 = arith.constant 0 : i32
    return %c0_i32, %c0_i32_0 : i32, i32
  }
  func.func @transform_6(%arg0: i32) -> (i32, i32) {
    %c0_i32 = arith.constant 0 : i32
    %c0_i32_0 = arith.constant 0 : i32
    %c0_i32_1 = arith.constant 0 : i32
    return %c0_i32, %c0_i32_0 : i32, i32
  }
  func.func @transform_7(%arg0: i32) -> (i32, i32) {
    %c0_i32 = arith.constant 0 : i32
    %c0_i32_0 = arith.constant 0 : i32
    return %arg0, %c0_i32 : i32, i32
  }
}

module attributes {stable_mosaic.version = 11 : i64} {
  func.func @actor_kernel(%arg0: i32, %arg1: memref<8x16xf32, #tpu.memory_space<vmem>>, %arg2: memref<16x128xf32, #tpu.memory_space<vmem>>, %arg3: memref<1x128xf32, #tpu.memory_space<vmem>>, %arg4: memref<128x128xf32, #tpu.memory_space<vmem>>, %arg5: memref<1x128xf32, #tpu.memory_space<vmem>>, %arg6: memref<128x128xf32, #tpu.memory_space<vmem>>, %arg7: memref<1x128xf32, #tpu.memory_space<vmem>>, %arg8: memref<8x4xf32, #tpu.memory_space<vmem>>) attributes {dimension_semantics = [#tpu.dimension_semantics<parallel>], iteration_bounds = array<i64: 1>, scalar_prefetch = 0 : i64, scratch_operands = 0 : i64, tpu.core_type = #tpu.core_type<tc>, window_params = [{transform_indices = @transform_0, window_bounds = array<i64: 8, 16>}, {pipeline_mode = #tpu.pipeline_mode<synchronous>, transform_indices = @transform_1, window_bounds = array<i64: 16, 128>}, {pipeline_mode = #tpu.pipeline_mode<synchronous>, transform_indices = @transform_2, window_bounds = array<i64: 1, 128>}, {pipeline_mode = #tpu.pipeline_mode<synchronous>, transform_indices = @transform_3, window_bounds = array<i64: 128, 128>}, {pipeline_mode = #tpu.pipeline_mode<synchronous>, transform_indices = @transform_4, window_bounds = array<i64: 1, 128>}, {pipeline_mode = #tpu.pipeline_mode<synchronous>, transform_indices = @transform_5, window_bounds = array<i64: 128, 128>}, {pipeline_mode = #tpu.pipeline_mode<synchronous>, transform_indices = @transform_6, window_bounds = array<i64: 1, 128>}, {transform_indices = @transform_7, window_bounds = array<i64: 8, 4>}]} {
    %c0 = arith.constant 0 : index
    %c0_0 = arith.constant 0 : index
    %0 = vector.load %arg1[%c0, %c0_0] : memref<8x16xf32, #tpu.memory_space<vmem>>, vector<8x16xf32>
    %c0_1 = arith.constant 0 : index
    %c0_2 = arith.constant 0 : index
    %1 = vector.load %arg2[%c0_1, %c0_2] : memref<16x128xf32, #tpu.memory_space<vmem>>, vector<16x128xf32>
    %cst = arith.constant dense<0.000000e+00> : vector<8x128xf32>
    %2 = tpu.matmul %0, %1, %cst {dimension_numbers = #tpu.dot_dimension_numbers<[1], [0], [0], [1], [0, 0, 1, 1], [], []>} : vector<8x16xf32>, vector<16x128xf32>, vector<8x128xf32> -> vector<8x128xf32>
    %c0_3 = arith.constant 0 : index
    %c0_4 = arith.constant 0 : index
    %3 = vector.load %arg3[%c0_3, %c0_4] : memref<1x128xf32, #tpu.memory_space<vmem>>, vector<1x128xf32>
    %4 = vector.broadcast %3 : vector<1x128xf32> to vector<8x128xf32>
    %5 = arith.addf %2, %4 : vector<8x128xf32>
    %cst_5 = arith.constant 0.000000e+00 : f32
    %6 = vector.broadcast %cst_5 : f32 to vector<8x128xf32>
    %7 = arith.maximumf %5, %6 : vector<8x128xf32>
    %c0_6 = arith.constant 0 : index
    %c0_7 = arith.constant 0 : index
    %8 = vector.load %arg4[%c0_6, %c0_7] : memref<128x128xf32, #tpu.memory_space<vmem>>, vector<128x128xf32>
    %cst_8 = arith.constant dense<0.000000e+00> : vector<8x128xf32>
    %9 = tpu.matmul %7, %8, %cst_8 {dimension_numbers = #tpu.dot_dimension_numbers<[1], [0], [0], [1], [0, 0, 1, 1], [], []>} : vector<8x128xf32>, vector<128x128xf32>, vector<8x128xf32> -> vector<8x128xf32>
    %c0_9 = arith.constant 0 : index
    %c0_10 = arith.constant 0 : index
    %10 = vector.load %arg5[%c0_9, %c0_10] : memref<1x128xf32, #tpu.memory_space<vmem>>, vector<1x128xf32>
    %11 = vector.broadcast %10 : vector<1x128xf32> to vector<8x128xf32>
    %12 = arith.addf %9, %11 : vector<8x128xf32>
    %cst_11 = arith.constant 0.000000e+00 : f32
    %13 = vector.broadcast %cst_11 : f32 to vector<8x128xf32>
    %14 = arith.maximumf %12, %13 : vector<8x128xf32>
    %c0_12 = arith.constant 0 : index
    %c0_13 = arith.constant 0 : index
    %15 = vector.load %arg6[%c0_12, %c0_13] : memref<128x128xf32, #tpu.memory_space<vmem>>, vector<128x128xf32>
    %cst_14 = arith.constant dense<0.000000e+00> : vector<8x128xf32>
    %16 = tpu.matmul %14, %15, %cst_14 {dimension_numbers = #tpu.dot_dimension_numbers<[1], [0], [0], [1], [0, 0, 1, 1], [], []>} : vector<8x128xf32>, vector<128x128xf32>, vector<8x128xf32> -> vector<8x128xf32>
    %c0_15 = arith.constant 0 : index
    %c0_16 = arith.constant 0 : index
    %17 = vector.load %arg7[%c0_15, %c0_16] : memref<1x128xf32, #tpu.memory_space<vmem>>, vector<1x128xf32>
    %18 = vector.broadcast %17 : vector<1x128xf32> to vector<8x128xf32>
    %19 = arith.addf %16, %18 : vector<8x128xf32>
    %20 = vector.extract_strided_slice %19 {offsets = [0, 0], sizes = [8, 4], strides = [1, 1]} : vector<8x128xf32> to vector<8x4xf32>
    %21 = math.tanh %20 : vector<8x4xf32>
    %cst_17 = arith.constant 2.000000e+00 : f32
    %22 = vector.broadcast %cst_17 : f32 to vector<8x4xf32>
    %23 = arith.mulf %21, %22 : vector<8x4xf32>
    %c0_18 = arith.constant 0 : index
    %c0_19 = arith.constant 0 : index
    %24 = vector.load %arg8[%c0_18, %c0_19] : memref<8x4xf32, #tpu.memory_space<vmem>>, vector<8x4xf32>
    tpu.vector_store %arg8[%c0_18, %c0_19], %23 {strides = array<i32>} : memref<8x4xf32, #tpu.memory_space<vmem>>, vector<8x4xf32>,
    return
  }
  func.func @transform_0(%arg0: i32) -> (i32, i32) {
    %c0_i32 = arith.constant 0 : i32
    %c0_i32_0 = arith.constant 0 : i32
    return %arg0, %c0_i32 : i32, i32
  }
  func.func @transform_1(%arg0: i32) -> (i32, i32) {
    %c0_i32 = arith.constant 0 : i32
    %c0_i32_0 = arith.constant 0 : i32
    %c0_i32_1 = arith.constant 0 : i32
    return %c0_i32, %c0_i32_0 : i32, i32
  }
  func.func @transform_2(%arg0: i32) -> (i32, i32) {
    %c0_i32 = arith.constant 0 : i32
    %c0_i32_0 = arith.constant 0 : i32
    %c0_i32_1 = arith.constant 0 : i32
    return %c0_i32, %c0_i32_0 : i32, i32
  }
  func.func @transform_3(%arg0: i32) -> (i32, i32) {
    %c0_i32 = arith.constant 0 : i32
    %c0_i32_0 = arith.constant 0 : i32
    %c0_i32_1 = arith.constant 0 : i32
    return %c0_i32, %c0_i32_0 : i32, i32
  }
  func.func @transform_4(%arg0: i32) -> (i32, i32) {
    %c0_i32 = arith.constant 0 : i32
    %c0_i32_0 = arith.constant 0 : i32
    %c0_i32_1 = arith.constant 0 : i32
    return %c0_i32, %c0_i32_0 : i32, i32
  }
  func.func @transform_5(%arg0: i32) -> (i32, i32) {
    %c0_i32 = arith.constant 0 : i32
    %c0_i32_0 = arith.constant 0 : i32
    %c0_i32_1 = arith.constant 0 : i32
    return %c0_i32, %c0_i32_0 : i32, i32
  }
  func.func @transform_6(%arg0: i32) -> (i32, i32) {
    %c0_i32 = arith.constant 0 : i32
    %c0_i32_0 = arith.constant 0 : i32
    %c0_i32_1 = arith.constant 0 : i32
    return %c0_i32, %c0_i32_0 : i32, i32
  }
  func.func @transform_7(%arg0: i32) -> (i32, i32) {
    %c0_i32 = arith.constant 0 : i32
    %c0_i32_0 = arith.constant 0 : i32
    return %arg0, %c0_i32 : i32, i32
  }
}

</mosaic_0001>

<bundles_post_ra>
// kernel: tpu_custom_call.1
= control target key start
LH: loop header
LB: loop body
LE: loop exit
PB: predicated region body
PF: predicated region fallthrough
CT: control target
= control target key end

     0   :  { %12 = vsyncpa [#allocation3], 0  ;;  %s841_s0 = inlined_call_operand.hbm [shape: f32[2,16], index: 0, kind: input, shape index: {}]   ;;  %s842_s1 = inlined_call_operand.hbm [shape: f32[16,128], index: 1, kind: input, shape index: {}]   ;;  %s843_s2 = inlined_call_operand.vmem [shape: f32[1,128], index: 2, kind: input, shape index: {}]   ;;  %s844_s3 = inlined_call_operand.hbm [shape: f32[128,128], index: 3, kind: input, shape index: {}]   ;;  %s845_s4 = inlined_call_operand.vmem [shape: f32[1,128], index: 4, kind: input, shape index: {}]   ;;  %s846_s5 = inlined_call_operand.hbm [shape: f32[128,128], index: 5, kind: input, shape index: {}]   ;;  %s847_s6 = inlined_call_operand.vmem [shape: f32[1,128], index: 6, kind: input, shape index: {}]   ;;  %s848_s7 = inlined_call_operand.hbm [shape: f32[2,4], index: 7, kind: output, shape index: {}]  }
   0x1   :  { %13 = vsyncpa [#allocation6], 0 }
   0x2   :  { %14 = vsyncpa [#allocation9], 0 }
   0x3   :  { %15 = vsyncpa [#allocation4], 0 }
   0x4   :  { %20 = vsyncadd [#allocation3], 96  ;;  %s678_s24 = smov [#allocation5]   ;;  %s560_s28 = scalar_lea.hbm %s842_s1, 256 }
   0x5   :  { %s33_s25 = sshll.u32 %s678_s24, 4  ;;  %p561_p0 = scmp.ne.s32.totalorder %s842_s1, %s560_s28  ;;  %s34_s25 = int_to_ptr.vmem [resolvable:$true] %s33_s25 }
   0x6   :  { %p564_p1 = scmp.lt.u32.totalorder %s560_s28, %s842_s1 }
   0x8   :  { %p566_p2 = pnand %p564_p1, %p561_p0 }
   0xa   :  { %569 = shalt.err (!%p566_p2)
}
   0xb   :  { %s570_s10 = scalar_lea.vmem %s34_s25, 256  ;;  %p575_p4 = scmp.lt.s32.totalorder %s34_s25, %s34_s25 }
   0xc   :  { %p571_p3 = scmp.ne.s32.totalorder %s34_s25, %s570_s10  ;;  %p576_p5 = scmp.lt.s32.totalorder %s570_s10, %s570_s10 }
   0xe   :  { %p577_p6 = por %p576_p5, %p575_p4 }
  0x10   :  { %p578_p7 = pnand %p577_p6, %p571_p3 }
  0x12   :  { %581 = shalt.err (!%p578_p7)
}
  0x13   :  { %s679_s11 = smov 128   ;;  %s680_s12 = smov 8  }
  0x14   :  { %39 = dma.hbm_to_vmem [thread:$0]  %s842_s1, 256, %s34_s25, [#allocation6], %s679_s11, %s679_s11, %s680_s12  }
  0x15   :  { %s681_s15 = smov [#allocation2]   ;;  %s582_s19 = scalar_lea.hbm %s841_s0, 32 }
  0x16   :  { %s21_s16 = sshll.u32 %s681_s15, 4  ;;  %p583_p8 = scmp.ne.s32.totalorder %s841_s0, %s582_s19  ;;  %s22_s16 = int_to_ptr.vmem [resolvable:$true] %s21_s16 }
  0x17   :  { %p586_p9 = scmp.lt.u32.totalorder %s582_s19, %s841_s0 }
  0x19   :  { %p588_p10 = pnand %p586_p9, %p583_p8 }
  0x1b   :  { %591 = shalt.err (!%p588_p10)
}
  0x1c   :  { %s592_s24 = scalar_lea.vmem %s22_s16, 32  ;;  %s596_s1 = scalar_lea.vmem %s22_s16, 128 }
  0x1d   :  { %p593_p11 = scmp.ne.s32.totalorder %s22_s16, %s592_s24  ;;  %p597_p12 = scmp.lt.s32.totalorder %s22_s16, %s22_s16 }
  0x1e   :  { %p598_p13 = scmp.lt.s32.totalorder %s596_s1, %s592_s24 }
  0x20   :  { %p599_p0 = por %p598_p13, %p597_p12 }
  0x22   :  { %p600_p1 = pnand %p599_p0, %p593_p11 }
  0x24   :  { %603 = shalt.err (!%p600_p1)
}
  0x25   :  { %s682_s25 = smov 32   ;;  %s683_s26 = smov 2  }
  0x26   :  { %27 = dma.hbm_to_vmem [thread:$0]  %s841_s0, 32, %s22_s16, [#allocation3], %s682_s25, %s682_s25, %s683_s26  }
  0x27   :  { %s684_s29 = smov [#allocation7]   ;;  %s685_s8 = smov [#allocation8]  }
  0x28   :  { %s47_s30 = sshll.u32 %s684_s29, 4  ;;  %s61_s9 = sshll.u32 %s685_s8, 4  ;;  %s48_s30 = int_to_ptr.vmem [resolvable:$true] %s47_s30  ;;  %s760_s9 = int_to_ptr.vmem [resolvable:$true] %s61_s9 }
  0x29   :  { %s604_s14 = scalar_lea.hbm %s844_s3, 2048 }
  0x2a   :  { %p605_p2 = scmp.ne.s32.totalorder %s844_s3, %s604_s14  ;;  %p608_p3 = scmp.lt.u32.totalorder %s604_s14, %s844_s3 }
  0x2c   :  { %p610_p4 = pnand %p608_p3, %p605_p2 }
  0x2e   :  { %613 = shalt.err (!%p610_p4)
}
  0x2f   :  { %s614_s0 = scalar_lea.vmem %s48_s30, 2048  ;;  %p619_p6 = scmp.lt.s32.totalorder %s48_s30, %s48_s30 }
  0x30   :  { %p615_p5 = scmp.ne.s32.totalorder %s48_s30, %s614_s0  ;;  %p620_p7 = scmp.lt.s32.totalorder %s614_s0, %s614_s0 }
  0x32   :  { %p621_p8 = por %p620_p7, %p619_p6 }
  0x34   :  { %p622_p9 = pnand %p621_p8, %p615_p5 }
  0x36   :  { %625 = shalt.err (!%p622_p9)
}
  0x37   :  { %53 = dma.hbm_to_vmem [thread:$0]  %s844_s3, 2048, %s48_s30, [#allocation6], %s679_s11, %s679_s11, %s680_s12  }
  0x38   :  { %s626_s23 = scalar_lea.hbm %s846_s5, 2048 }
  0x39   :  { %p627_p10 = scmp.ne.s32.totalorder %s846_s5, %s626_s23  ;;  %p630_p11 = scmp.lt.u32.totalorder %s626_s23, %s846_s5 }
  0x3b   :  { %p632_p12 = pnand %p630_p11, %p627_p10 }
  0x3d   :  { %635 = shalt.err (!%p632_p12)
}
  0x3e   :  { %s636_s29 = scalar_lea.vmem %s760_s9, 2048  ;;  %p641_p0 = scmp.lt.s32.totalorder %s760_s9, %s760_s9 }
  0x3f   :  { %p637_p13 = scmp.ne.s32.totalorder %s760_s9, %s636_s29  ;;  %p642_p1 = scmp.lt.s32.totalorder %s636_s29, %s636_s29 }
  0x41   :  { %p643_p2 = por %p642_p1, %p641_p0 }
  0x43   :  { %p644_p3 = pnand %p643_p2, %p637_p13 }
  0x45   :  { %647 = shalt.err (!%p644_p3)
}
  0x46   :  { %67 = dma.hbm_to_vmem [thread:$0]  %s846_s5, 2048, %s760_s9, [#allocation9], %s679_s11, %s679_s11, %s680_s12  }
  0x47   :  { %670 = dma.done.wait [#allocation3], 128  }
  0x48   :  { %671 = vsyncadd [#allocation3], 4294967168 }
  0x49   :  { %672 = dma.done.wait [#allocation6], 2304  }
  0x4a   :  { %673 = vsyncadd [#allocation6], 4294964992 }
  0x4b   :  { %674 = dma.done.wait [#allocation9], 2048  }
  0x4c   :  { %675 = vsyncadd [#allocation9], 4294965248  ;;  %v686_v0 = vmov 0.0|0.0   ;;  %vm687_vm0 = vmmov 0   ;;  %v688_v1 = vmov 0.0   ;;  %v83_v2 = vld [vmem:[#allocation5] sm:$0xff] }
  0x4d   :  { %495 = vmatprep.subr.bf16.mxu0 %v686_v0  ;;  %422 = vmatprep.mubr.msk.f32.mxu0 %vm687_vm0, %v688_v1  ;;  %v84_v3 = vld [vmem:[#allocation5 + $0x8] sm:$0xff]  ;;  %v167_v5 = vld [vmem:[#allocation7] sm:$0xff]  ;;  %v168_v6 = vld [vmem:[#allocation7 + $0x8] sm:$0xff]  ;;  %vm92_vm1 = vcmask 130048   ;;  %vm356_vm2 = vcmask 31744  }
  0x4e   :  { %498 = vmatprep.subr.bf16.mxu1 %v686_v0  ;;  %457 = vmatprep.mubr.msk.f32.mxu1 %vm687_vm0, %v688_v1  ;;  %v496_v4 = vpack.c.bf16 %v84_v3, %v83_v2  ;;  %v169_v7 = vld [vmem:[#allocation7 + $0x10] sm:$0xff]  ;;  %v499_v8 = vpack.c.bf16 %v168_v6, %v167_v5  ;;  %v170_v9 = vld [vmem:[#allocation7 + $0x18] sm:$0xff]  ;;  %v82_v10 = vld [vmem:[#allocation2] sm:$0xff] }
  0x4f   :  { %v502_v11 = vpack.c.bf16 %v170_v9, %v169_v7  ;;  %v171_v12 = vld [vmem:[#allocation7 + $0x20] sm:$0xff]  ;;  %v172_v13 = vld [vmem:[#allocation7 + $0x28] sm:$0xff]  ;;  %v173_v15 = vld [vmem:[#allocation7 + $0x30] sm:$0xff] }
  0x50   :  { %497 = vmatpush3.bf16.msra.mxu0 %v496_v4  ;;  %500 = vmatpush3.bf16.msra.mxu1 %v499_v8  ;;  %v505_v14 = vpack.c.bf16 %v172_v13, %v171_v12  ;;  %v174_v16 = vld [vmem:[#allocation7 + $0x38] sm:$0xff]  ;;  %v175_v18 = vld [vmem:[#allocation7 + $0x40] sm:$0xff]  ;;  %v176_v19 = vld [vmem:[#allocation7 + $0x48] sm:$0xff] }
  0x51   :  { %522 = vmatprep.subr.bf16.mxu0 %v686_v0  ;;  %501 = vmatprep.subr.bf16.mxu1 %v686_v0  ;;  %v508_v17 = vpack.c.bf16 %v174_v16, %v173_v15  ;;  %v511_v20 = vpack.c.bf16 %v176_v19, %v175_v18  ;;  %v177_v21 = vld [vmem:[#allocation7 + $0x50] sm:$0xff]  ;;  %v178_v22 = vld [vmem:[#allocation7 + $0x58] sm:$0xff]  ;;  %v179_v24 = vld [vmem:[#allocation7 + $0x60] sm:$0xff] }
  0x52   :  { %v514_v23 = vpack.c.bf16 %v178_v22, %v177_v21  ;;  %v180_v25 = vld [vmem:[#allocation7 + $0x68] sm:$0xff]  ;;  %v181_v27 = vld [vmem:[#allocation7 + $0x70] sm:$0xff]  ;;  %v182_v28 = vld [vmem:[#allocation7 + $0x78] sm:$0xff] }
  0x53   :  { %423 = vmatmul.mubr.msk.f32.vlgmr.msra.gmra.mrb[0].mxu0 %vm92_vm1, %v82_v10  ;;  %v517_v26 = vpack.c.bf16 %v180_v25, %v179_v24  ;;  %v520_v29 = vpack.c.bf16 %v182_v28, %v181_v27  ;;  %v261_v30 = vld [vmem:[#allocation8] sm:$0xff]  ;;  %v262_v31 = vld [vmem:[#allocation8 + $0x8] sm:$0xff]  ;;  %v263_v32 = vld [vmem:[#allocation8 + $0x10] sm:$0xff] }
  0x54   :  { %492 = vmatprep.mubr.msk.f32.mxu0 %vm687_vm0, %v688_v1  ;;  %503 = vmatpush3.bf16.msra.mxu1 %v502_v11  ;;  %v523_v33 = vpack.c.bf16 %v262_v31, %v261_v30  ;;  %v264_v34 = vld [vmem:[#allocation8 + $0x18] sm:$0xff]  ;;  %v265_v36 = vld [vmem:[#allocation8 + $0x20] sm:$0xff]  ;;  %v266_v37 = vld [vmem:[#allocation8 + $0x28] sm:$0xff] }
  0x55   :  { %504 = vmatprep.subr.bf16.mxu1 %v686_v0  ;;  %v526_v35 = vpack.c.bf16 %v264_v34, %v263_v32  ;;  %v529_v38 = vpack.c.bf16 %v266_v37, %v265_v36  ;;  %v267_v39 = vld [vmem:[#allocation8 + $0x30] sm:$0xff]  ;;  %v268_v40 = vld [vmem:[#allocation8 + $0x38] sm:$0xff]  ;;  %v269_v42 = vld [vmem:[#allocation8 + $0x40] sm:$0xff] }
  0x56   :  { %524 = vmatpush3.bf16.msra.mxu0 %v523_v33  ;;  %v532_v41 = vpack.c.bf16 %v268_v40, %v267_v39  ;;  %v270_v43 = vld [vmem:[#allocation8 + $0x48] sm:$0xff]  ;;  %v271_v45 = vld [vmem:[#allocation8 + $0x50] sm:$0xff]  ;;  %v272_v46 = vld [vmem:[#allocation8 + $0x58] sm:$0xff] }
  0x57   :  { %525 = vmatprep.subr.bf16.mxu0 %v686_v0  ;;  %v535_v44 = vpack.c.bf16 %v270_v43, %v269_v42  ;;  %v538_v47 = vpack.c.bf16 %v272_v46, %v271_v45  ;;  %v273_v48 = vld [vmem:[#allocation8 + $0x60] sm:$0xff]  ;;  %v274_v49 = vld [vmem:[#allocation8 + $0x68] sm:$0xff]  ;;  %v275_v56 = vld [vmem:[#allocation8 + $0x70] sm:$0xff] }
  0x58   :  { %506 = vmatpush3.bf16.msra.mxu1 %v505_v14  ;;  %v541_v50 = vpack.c.bf16 %v274_v49, %v273_v48  ;;  %v377_v51 = vld [vmem:[%s843_s2] ss:$0 sm:$0xff]  ;;  %v276_v57 = vld [vmem:[#allocation8 + $0x78] sm:$0xff] }
  0x59   :  { %507 = vmatprep.subr.bf16.mxu1 %v686_v0  ;;  %v544_v58 = vpack.c.bf16 %v276_v57, %v275_v56  ;;  %v379_v59 = vld [vmem:[%s845_s4] ss:$0 sm:$0xff] }
  0x5a   :  { %527 = vmatpush3.bf16.msra.mxu0 %v526_v35 }
  0x5b   :  { %528 = vmatprep.subr.bf16.mxu0 %v686_v0 }
  0x5c   :  { %509 = vmatpush3.bf16.msra.mxu1 %v508_v17 }
  0x5d   :  { %510 = vmatprep.subr.bf16.mxu1 %v686_v0 }
  0x5e   :  { %530 = vmatpush3.bf16.msra.mxu0 %v529_v38 }
  0x5f   :  { %531 = vmatprep.subr.bf16.mxu0 %v686_v0 }
  0x60   :  { %512 = vmatpush3.bf16.msra.mxu1 %v511_v20 }
  0x61   :  { %513 = vmatprep.subr.bf16.mxu1 %v686_v0 }
  0x62   :  { %533 = vmatpush3.bf16.msra.mxu0 %v532_v41 }
  0x63   :  { %534 = vmatprep.subr.bf16.mxu0 %v686_v0 }
  0x64   :  { %515 = vmatpush3.bf16.msra.mxu1 %v514_v23 }
  0x65   :  { %516 = vmatprep.subr.bf16.mxu1 %v686_v0 }
  0x66   :  { %536 = vmatpush3.bf16.msra.mxu0 %v535_v44 }
  0x67   :  { %537 = vmatprep.subr.bf16.mxu0 %v686_v0 }
  0x68   :  { %518 = vmatpush3.bf16.msra.mxu1 %v517_v26 }
  0x69   :  { %519 = vmatprep.subr.bf16.mxu1 %v686_v0 }
  0x6a   :  { %539 = vmatpush3.bf16.msra.mxu0 %v538_v47 }
  0x6b   :  { %540 = vmatprep.subr.bf16.mxu0 %v686_v0 }
  0x6c   :  { %521 = vmatpush3.bf16.msra.mxu1 %v520_v29 }
  0x6e   :  { %542 = vmatpush3.bf16.msra.mxu0 %v541_v50 }
  0x6f   :  { %543 = vmatprep.subr.bf16.mxu0 %v686_v0  ;;  %v380_v0 = vld [vmem:[%s847_s6] ss:$0 sm:$0xff] }
  0x72   :  { %545 = vmatpush3.bf16.msra.mxu0 %v544_v58 }
 0x126   :  { %v162_v52 = vpop.f32.mrb[0].mxu0 }
 0x127   :  { %v163_v53 = vadd.f32 %v377_v51, %v162_v52  ;;  %v424_v54 = vpop.f32.mrb[1].mxu0 }
 0x129   :  { %v166_v55 = vmax.f32 %v163_v53, 0.0 }
 0x12b   :  { %458 = vmatmul.mubr.f32.vlgmr.msra.gmra.mrb[0].mxu1 %v166_v55 }
 0x1fe   :  { %v256_v60 = vpop.f32.mrb[0].mxu1 }
 0x1ff   :  { %v257_v61 = vadd.f32 %v379_v59, %v256_v60  ;;  %v459_v62 = vpop.f32.mrb[1].mxu1 }
 0x201   :  { %v260_v63 = vmax.f32 %v257_v61, 0.0 }
 0x203   :  { %493 = vmatmul.mubr.f32.vlgmr.msra.gmra.mrb[2].mxu0 %v260_v63 }
 0x2d6   :  { %v350_v1 = vpop.f32.mrb[2].mxu0 }
 0x2d7   :  { %v351_v2 = vadd.f32 %v380_v0, %v350_v1  ;;  %v494_v3 = vpop.f32.mrb[3].mxu0 }
 0x2d9   :  { %558 = vtanh.f32 %v351_v2 }
 0x2e3   :  { %v559_v4 = vpop.eup %558 }
 0x2e4   :  { %v355_v5 = vmul.f32 2.0, %v559_v4 }
 0x2e6   :  { %357 = vst.msk [vmem:[#allocation10] sm:$0xff] %vm356_vm2, %v355_v5 }
 0x2e7   :  { %362 = vsyncadd [#allocation4], 96  ;;  %s689_s10 = smov [#allocation10]  }
 0x2e8   :  { %s363_s4 = sshll.u32 %s689_s10, 4  ;;  %s364_s4 = int_to_ptr.vmem [resolvable:$true] %s363_s4 }
 0x2e9   :  { %s648_s13 = scalar_lea.vmem %s364_s4, 32  ;;  %s652_s14 = scalar_lea.vmem %s364_s4, 128 }
 0x2ea   :  { %p649_p4 = scmp.ne.s32.totalorder %s364_s4, %s648_s13  ;;  %p653_p5 = scmp.lt.s32.totalorder %s364_s4, %s364_s4 }
 0x2eb   :  { %p654_p6 = scmp.lt.s32.totalorder %s652_s14, %s648_s13 }
 0x2ed   :  { %p655_p7 = por %p654_p6, %p653_p5 }
 0x2ef   :  { %p656_p8 = pnand %p655_p7, %p649_p4 }
 0x2f1   :  { %659 = shalt.err (!%p656_p8)
}
 0x2f2   :  { %s660_s17 = scalar_lea.hbm %s848_s7, 32 }
 0x2f3   :  { %p661_p9 = scmp.ne.s32.totalorder %s848_s7, %s660_s17  ;;  %p664_p10 = scmp.lt.u32.totalorder %s660_s17, %s848_s7 }
 0x2f5   :  { %p666_p11 = pnand %p664_p10, %p661_p9 }
 0x2f7   :  { %669 = shalt.err (!%p666_p11)
}
 0x2f8   :  { %369 = dma.vmem_to_hbm [thread:$0]  %s364_s4, 32, %s848_s7, [#allocation4], %s682_s25, %s682_s25, %s683_s26  }
 0x2f9   :  { %676 = dma.done.wait [#allocation4], 128  }
 0x2fa   :  { %677 = vsyncadd [#allocation4], 4294967168 }
 0x2fb   :  { %373 = vsyncpa [#allocation3], 1 }
 0x2fc   :  { %374 = vsyncpa [#allocation6], 1 }
 0x2fd   :  { %375 = vsyncpa [#allocation9], 1 }
 0x2fe   :  { %376 = vsyncpa [#allocation4], 1 }

// kernel: tpu_custom_call.1
= control target key start
LH: loop header
LB: loop body
LE: loop exit
PB: predicated region body
PF: predicated region fallthrough
CT: control target
= control target key end

     0   :  { %12 = vsyncpa [#allocation3], 0  ;;  %s841_s0 = inlined_call_operand.hbm [shape: f32[2,16], index: 0, kind: input, shape index: {}]   ;;  %s842_s1 = inlined_call_operand.hbm [shape: f32[16,128], index: 1, kind: input, shape index: {}]   ;;  %s843_s2 = inlined_call_operand.vmem [shape: f32[1,128], index: 2, kind: input, shape index: {}]   ;;  %s844_s3 = inlined_call_operand.hbm [shape: f32[128,128], index: 3, kind: input, shape index: {}]   ;;  %s845_s4 = inlined_call_operand.vmem [shape: f32[1,128], index: 4, kind: input, shape index: {}]   ;;  %s846_s5 = inlined_call_operand.hbm [shape: f32[128,128], index: 5, kind: input, shape index: {}]   ;;  %s847_s6 = inlined_call_operand.vmem [shape: f32[1,128], index: 6, kind: input, shape index: {}]   ;;  %s848_s7 = inlined_call_operand.hbm [shape: f32[2,4], index: 7, kind: output, shape index: {}]  }
   0x1   :  { %13 = vsyncpa [#allocation6], 0 }
   0x2   :  { %14 = vsyncpa [#allocation9], 0 }
   0x3   :  { %15 = vsyncpa [#allocation4], 0 }
   0x4   :  { %20 = vsyncadd [#allocation3], 96  ;;  %s678_s24 = smov [#allocation5]   ;;  %s560_s28 = scalar_lea.hbm %s842_s1, 256 }
   0x5   :  { %s33_s25 = sshll.u32 %s678_s24, 4  ;;  %p561_p0 = scmp.ne.s32.totalorder %s842_s1, %s560_s28  ;;  %s34_s25 = int_to_ptr.vmem [resolvable:$true] %s33_s25 }
   0x6   :  { %p564_p1 = scmp.lt.u32.totalorder %s560_s28, %s842_s1 }
   0x8   :  { %p566_p2 = pnand %p564_p1, %p561_p0 }
   0xa   :  { %569 = shalt.err (!%p566_p2)
}
   0xb   :  { %s570_s10 = scalar_lea.vmem %s34_s25, 256  ;;  %p575_p4 = scmp.lt.s32.totalorder %s34_s25, %s34_s25 }
   0xc   :  { %p571_p3 = scmp.ne.s32.totalorder %s34_s25, %s570_s10  ;;  %p576_p5 = scmp.lt.s32.totalorder %s570_s10, %s570_s10 }
   0xe   :  { %p577_p6 = por %p576_p5, %p575_p4 }
  0x10   :  { %p578_p7 = pnand %p577_p6, %p571_p3 }
  0x12   :  { %581 = shalt.err (!%p578_p7)
}
  0x13   :  { %s679_s11 = smov 128   ;;  %s680_s12 = smov 8  }
  0x14   :  { %39 = dma.hbm_to_vmem [thread:$0]  %s842_s1, 256, %s34_s25, [#allocation6], %s679_s11, %s679_s11, %s680_s12  }
  0x15   :  { %s681_s15 = smov [#allocation2]   ;;  %s582_s19 = scalar_lea.hbm %s841_s0, 32 }
  0x16   :  { %s21_s16 = sshll.u32 %s681_s15, 4  ;;  %p583_p8 = scmp.ne.s32.totalorder %s841_s0, %s582_s19  ;;  %s22_s16 = int_to_ptr.vmem [resolvable:$true] %s21_s16 }
  0x17   :  { %p586_p9 = scmp.lt.u32.totalorder %s582_s19, %s841_s0 }
  0x19   :  { %p588_p10 = pnand %p586_p9, %p583_p8 }
  0x1b   :  { %591 = shalt.err (!%p588_p10)
}
  0x1c   :  { %s592_s24 = scalar_lea.vmem %s22_s16, 32  ;;  %s596_s1 = scalar_lea.vmem %s22_s16, 128 }
  0x1d   :  { %p593_p11 = scmp.ne.s32.totalorder %s22_s16, %s592_s24  ;;  %p597_p12 = scmp.lt.s32.totalorder %s22_s16, %s22_s16 }
  0x1e   :  { %p598_p13 = scmp.lt.s32.totalorder %s596_s1, %s592_s24 }
  0x20   :  { %p599_p0 = por %p598_p13, %p597_p12 }
  0x22   :  { %p600_p1 = pnand %p599_p0, %p593_p11 }
  0x24   :  { %603 = shalt.err (!%p600_p1)
}
  0x25   :  { %s682_s25 = smov 32   ;;  %s683_s26 = smov 2  }
  0x26   :  { %27 = dma.hbm_to_vmem [thread:$0]  %s841_s0, 32, %s22_s16, [#allocation3], %s682_s25, %s682_s25, %s683_s26  }
  0x27   :  { %s684_s29 = smov [#allocation7]   ;;  %s685_s8 = smov [#allocation8]  }
  0x28   :  { %s47_s30 = sshll.u32 %s684_s29, 4  ;;  %s61_s9 = sshll.u32 %s685_s8, 4  ;;  %s48_s30 = int_to_ptr.vmem [resolvable:$true] %s47_s30  ;;  %s760_s9 = int_to_ptr.vmem [resolvable:$true] %s61_s9 }
  0x29   :  { %s604_s14 = scalar_lea.hbm %s844_s3, 2048 }
  0x2a   :  { %p605_p2 = scmp.ne.s32.totalorder %s844_s3, %s604_s14  ;;  %p608_p3 = scmp.lt.u32.totalorder %s604_s14, %s844_s3 }
  0x2c   :  { %p610_p4 = pnand %p608_p3, %p605_p2 }
  0x2e   :  { %613 = shalt.err (!%p610_p4)
}
  0x2f   :  { %s614_s0 = scalar_lea.vmem %s48_s30, 2048  ;;  %p619_p6 = scmp.lt.s32.totalorder %s48_s30, %s48_s30 }
  0x30   :  { %p615_p5 = scmp.ne.s32.totalorder %s48_s30, %s614_s0  ;;  %p620_p7 = scmp.lt.s32.totalorder %s614_s0, %s614_s0 }
  0x32   :  { %p621_p8 = por %p620_p7, %p619_p6 }
  0x34   :  { %p622_p9 = pnand %p621_p8, %p615_p5 }
  0x36   :  { %625 = shalt.err (!%p622_p9)
}
  0x37   :  { %53 = dma.hbm_to_vmem [thread:$0]  %s844_s3, 2048, %s48_s30, [#allocation6], %s679_s11, %s679_s11, %s680_s12  }
  0x38   :  { %s626_s23 = scalar_lea.hbm %s846_s5, 2048 }
  0x39   :  { %p627_p10 = scmp.ne.s32.totalorder %s846_s5, %s626_s23  ;;  %p630_p11 = scmp.lt.u32.totalorder %s626_s23, %s846_s5 }
  0x3b   :  { %p632_p12 = pnand %p630_p11, %p627_p10 }
  0x3d   :  { %635 = shalt.err (!%p632_p12)
}
  0x3e   :  { %s636_s29 = scalar_lea.vmem %s760_s9, 2048  ;;  %p641_p0 = scmp.lt.s32.totalorder %s760_s9, %s760_s9 }
  0x3f   :  { %p637_p13 = scmp.ne.s32.totalorder %s760_s9, %s636_s29  ;;  %p642_p1 = scmp.lt.s32.totalorder %s636_s29, %s636_s29 }
  0x41   :  { %p643_p2 = por %p642_p1, %p641_p0 }
  0x43   :  { %p644_p3 = pnand %p643_p2, %p637_p13 }
  0x45   :  { %647 = shalt.err (!%p644_p3)
}
  0x46   :  { %67 = dma.hbm_to_vmem [thread:$0]  %s846_s5, 2048, %s760_s9, [#allocation9], %s679_s11, %s679_s11, %s680_s12  }
  0x47   :  { %670 = dma.done.wait [#allocation3], 128  }
  0x48   :  { %671 = vsyncadd [#allocation3], 4294967168 }
  0x49   :  { %672 = dma.done.wait [#allocation6], 2304  }
  0x4a   :  { %673 = vsyncadd [#allocation6], 4294964992 }
  0x4b   :  { %674 = dma.done.wait [#allocation9], 2048  }
  0x4c   :  { %675 = vsyncadd [#allocation9], 4294965248  ;;  %v686_v0 = vmov 0.0|0.0   ;;  %vm687_vm0 = vmmov 0   ;;  %v688_v1 = vmov 0.0   ;;  %v83_v2 = vld [vmem:[#allocation5] sm:$0xff] }
  0x4d   :  { %495 = vmatprep.subr.bf16.mxu0 %v686_v0  ;;  %422 = vmatprep.mubr.msk.f32.mxu0 %vm687_vm0, %v688_v1  ;;  %v84_v3 = vld [vmem:[#allocation5 + $0x8] sm:$0xff]  ;;  %v167_v5 = vld [vmem:[#allocation7] sm:$0xff]  ;;  %v168_v6 = vld [vmem:[#allocation7 + $0x8] sm:$0xff]  ;;  %vm92_vm1 = vcmask 130048   ;;  %vm356_vm2 = vcmask 31744  }
  0x4e   :  { %498 = vmatprep.subr.bf16.mxu1 %v686_v0  ;;  %457 = vmatprep.mubr.msk.f32.mxu1 %vm687_vm0, %v688_v1  ;;  %v496_v4 = vpack.c.bf16 %v84_v3, %v83_v2  ;;  %v169_v7 = vld [vmem:[#allocation7 + $0x10] sm:$0xff]  ;;  %v499_v8 = vpack.c.bf16 %v168_v6, %v167_v5  ;;  %v170_v9 = vld [vmem:[#allocation7 + $0x18] sm:$0xff]  ;;  %v82_v10 = vld [vmem:[#allocation2] sm:$0xff] }
  0x4f   :  { %v502_v11 = vpack.c.bf16 %v170_v9, %v169_v7  ;;  %v171_v12 = vld [vmem:[#allocation7 + $0x20] sm:$0xff]  ;;  %v172_v13 = vld [vmem:[#allocation7 + $0x28] sm:$0xff]  ;;  %v173_v15 = vld [vmem:[#allocation7 + $0x30] sm:$0xff] }
  0x50   :  { %497 = vmatpush3.bf16.msra.mxu0 %v496_v4  ;;  %500 = vmatpush3.bf16.msra.mxu1 %v499_v8  ;;  %v505_v14 = vpack.c.bf16 %v172_v13, %v171_v12  ;;  %v174_v16 = vld [vmem:[#allocation7 + $0x38] sm:$0xff]  ;;  %v175_v18 = vld [vmem:[#allocation7 + $0x40] sm:$0xff]  ;;  %v176_v19 = vld [vmem:[#allocation7 + $0x48] sm:$0xff] }
  0x51   :  { %522 = vmatprep.subr.bf16.mxu0 %v686_v0  ;;  %501 = vmatprep.subr.bf16.mxu1 %v686_v0  ;;  %v508_v17 = vpack.c.bf16 %v174_v16, %v173_v15  ;;  %v511_v20 = vpack.c.bf16 %v176_v19, %v175_v18  ;;  %v177_v21 = vld [vmem:[#allocation7 + $0x50] sm:$0xff]  ;;  %v178_v22 = vld [vmem:[#allocation7 + $0x58] sm:$0xff]  ;;  %v179_v24 = vld [vmem:[#allocation7 + $0x60] sm:$0xff] }
  0x52   :  { %v514_v23 = vpack.c.bf16 %v178_v22, %v177_v21  ;;  %v180_v25 = vld [vmem:[#allocation7 + $0x68] sm:$0xff]  ;;  %v181_v27 = vld [vmem:[#allocation7 + $0x70] sm:$0xff]  ;;  %v182_v28 = vld [vmem:[#allocation7 + $0x78] sm:$0xff] }
  0x53   :  { %423 = vmatmul.mubr.msk.f32.vlgmr.msra.gmra.mrb[0].mxu0 %vm92_vm1, %v82_v10  ;;  %v517_v26 = vpack.c.bf16 %v180_v25, %v179_v24  ;;  %v520_v29 = vpack.c.bf16 %v182_v28, %v181_v27  ;;  %v261_v30 = vld [vmem:[#allocation8] sm:$0xff]  ;;  %v262_v31 = vld [vmem:[#allocation8 + $0x8] sm:$0xff]  ;;  %v263_v32 = vld [vmem:[#allocation8 + $0x10] sm:$0xff] }
  0x54   :  { %492 = vmatprep.mubr.msk.f32.mxu0 %vm687_vm0, %v688_v1  ;;  %503 = vmatpush3.bf16.msra.mxu1 %v502_v11  ;;  %v523_v33 = vpack.c.bf16 %v262_v31, %v261_v30  ;;  %v264_v34 = vld [vmem:[#allocation8 + $0x18] sm:$0xff]  ;;  %v265_v36 = vld [vmem:[#allocation8 + $0x20] sm:$0xff]  ;;  %v266_v37 = vld [vmem:[#allocation8 + $0x28] sm:$0xff] }
  0x55   :  { %504 = vmatprep.subr.bf16.mxu1 %v686_v0  ;;  %v526_v35 = vpack.c.bf16 %v264_v34, %v263_v32  ;;  %v529_v38 = vpack.c.bf16 %v266_v37, %v265_v36  ;;  %v267_v39 = vld [vmem:[#allocation8 + $0x30] sm:$0xff]  ;;  %v268_v40 = vld [vmem:[#allocation8 + $0x38] sm:$0xff]  ;;  %v269_v42 = vld [vmem:[#allocation8 + $0x40] sm:$0xff] }
  0x56   :  { %524 = vmatpush3.bf16.msra.mxu0 %v523_v33  ;;  %v532_v41 = vpack.c.bf16 %v268_v40, %v267_v39  ;;  %v270_v43 = vld [vmem:[#allocation8 + $0x48] sm:$0xff]  ;;  %v271_v45 = vld [vmem:[#allocation8 + $0x50] sm:$0xff]  ;;  %v272_v46 = vld [vmem:[#allocation8 + $0x58] sm:$0xff] }
  0x57   :  { %525 = vmatprep.subr.bf16.mxu0 %v686_v0  ;;  %v535_v44 = vpack.c.bf16 %v270_v43, %v269_v42  ;;  %v538_v47 = vpack.c.bf16 %v272_v46, %v271_v45  ;;  %v273_v48 = vld [vmem:[#allocation8 + $0x60] sm:$0xff]  ;;  %v274_v49 = vld [vmem:[#allocation8 + $0x68] sm:$0xff]  ;;  %v275_v56 = vld [vmem:[#allocation8 + $0x70] sm:$0xff] }
  0x58   :  { %506 = vmatpush3.bf16.msra.mxu1 %v505_v14  ;;  %v541_v50 = vpack.c.bf16 %v274_v49, %v273_v48  ;;  %v377_v51 = vld [vmem:[%s843_s2] ss:$0 sm:$0xff]  ;;  %v276_v57 = vld [vmem:[#allocation8 + $0x78] sm:$0xff] }
  0x59   :  { %507 = vmatprep.subr.bf16.mxu1 %v686_v0  ;;  %v544_v58 = vpack.c.bf16 %v276_v57, %v275_v56  ;;  %v379_v59 = vld [vmem:[%s845_s4] ss:$0 sm:$0xff] }
  0x5a   :  { %527 = vmatpush3.bf16.msra.mxu0 %v526_v35 }
  0x5b   :  { %528 = vmatprep.subr.bf16.mxu0 %v686_v0 }
  0x5c   :  { %509 = vmatpush3.bf16.msra.mxu1 %v508_v17 }
  0x5d   :  { %510 = vmatprep.subr.bf16.mxu1 %v686_v0 }
  0x5e   :  { %530 = vmatpush3.bf16.msra.mxu0 %v529_v38 }
  0x5f   :  { %531 = vmatprep.subr.bf16.mxu0 %v686_v0 }
  0x60   :  { %512 = vmatpush3.bf16.msra.mxu1 %v511_v20 }
  0x61   :  { %513 = vmatprep.subr.bf16.mxu1 %v686_v0 }
  0x62   :  { %533 = vmatpush3.bf16.msra.mxu0 %v532_v41 }
  0x63   :  { %534 = vmatprep.subr.bf16.mxu0 %v686_v0 }
  0x64   :  { %515 = vmatpush3.bf16.msra.mxu1 %v514_v23 }
  0x65   :  { %516 = vmatprep.subr.bf16.mxu1 %v686_v0 }
  0x66   :  { %536 = vmatpush3.bf16.msra.mxu0 %v535_v44 }
  0x67   :  { %537 = vmatprep.subr.bf16.mxu0 %v686_v0 }
  0x68   :  { %518 = vmatpush3.bf16.msra.mxu1 %v517_v26 }
  0x69   :  { %519 = vmatprep.subr.bf16.mxu1 %v686_v0 }
  0x6a   :  { %539 = vmatpush3.bf16.msra.mxu0 %v538_v47 }
  0x6b   :  { %540 = vmatprep.subr.bf16.mxu0 %v686_v0 }
  0x6c   :  { %521 = vmatpush3.bf16.msra.mxu1 %v520_v29 }
  0x6e   :  { %542 = vmatpush3.bf16.msra.mxu0 %v541_v50 }
  0x6f   :  { %543 = vmatprep.subr.bf16.mxu0 %v686_v0  ;;  %v380_v0 = vld [vmem:[%s847_s6] ss:$0 sm:$0xff] }
  0x72   :  { %545 = vmatpush3.bf16.msra.mxu0 %v544_v58 }
 0x126   :  { %v162_v52 = vpop.f32.mrb[0].mxu0 }
 0x127   :  { %v163_v53 = vadd.f32 %v377_v51, %v162_v52  ;;  %v424_v54 = vpop.f32.mrb[1].mxu0 }
 0x129   :  { %v166_v55 = vmax.f32 %v163_v53, 0.0 }
 0x12b   :  { %458 = vmatmul.mubr.f32.vlgmr.msra.gmra.mrb[0].mxu1 %v166_v55 }
 0x1fe   :  { %v256_v60 = vpop.f32.mrb[0].mxu1 }
 0x1ff   :  { %v257_v61 = vadd.f32 %v379_v59, %v256_v60  ;;  %v459_v62 = vpop.f32.mrb[1].mxu1 }
 0x201   :  { %v260_v63 = vmax.f32 %v257_v61, 0.0 }
 0x203   :  { %493 = vmatmul.mubr.f32.vlgmr.msra.gmra.mrb[2].mxu0 %v260_v63 }
 0x2d6   :  { %v350_v1 = vpop.f32.mrb[2].mxu0 }
 0x2d7   :  { %v351_v2 = vadd.f32 %v380_v0, %v350_v1  ;;  %v494_v3 = vpop.f32.mrb[3].mxu0 }
 0x2d9   :  { %558 = vtanh.f32 %v351_v2 }
 0x2e3   :  { %v559_v4 = vpop.eup %558 }
 0x2e4   :  { %v355_v5 = vmul.f32 2.0, %v559_v4 }
 0x2e6   :  { %357 = vst.msk [vmem:[#allocation10] sm:$0xff] %vm356_vm2, %v355_v5 }
 0x2e7   :  { %362 = vsyncadd [#allocation4], 96  ;;  %s689_s10 = smov [#allocation10]  }
 0x2e8   :  { %s363_s4 = sshll.u32 %s689_s10, 4  ;;  %s364_s4 = int_to_ptr.vmem [resolvable:$true] %s363_s4 }
 0x2e9   :  { %s648_s13 = scalar_lea.vmem %s364_s4, 32  ;;  %s652_s14 = scalar_lea.vmem %s364_s4, 128 }
 0x2ea   :  { %p649_p4 = scmp.ne.s32.totalorder %s364_s4, %s648_s13  ;;  %p653_p5 = scmp.lt.s32.totalorder %s364_s4, %s364_s4 }
 0x2eb   :  { %p654_p6 = scmp.lt.s32.totalorder %s652_s14, %s648_s13 }
 0x2ed   :  { %p655_p7 = por %p654_p6, %p653_p5 }
 0x2ef   :  { %p656_p8 = pnand %p655_p7, %p649_p4 }
 0x2f1   :  { %659 = shalt.err (!%p656_p8)
}
 0x2f2   :  { %s660_s17 = scalar_lea.hbm %s848_s7, 32 }
 0x2f3   :  { %p661_p9 = scmp.ne.s32.totalorder %s848_s7, %s660_s17  ;;  %p664_p10 = scmp.lt.u32.totalorder %s660_s17, %s848_s7 }
 0x2f5   :  { %p666_p11 = pnand %p664_p10, %p661_p9 }
 0x2f7   :  { %669 = shalt.err (!%p666_p11)
}
 0x2f8   :  { %369 = dma.vmem_to_hbm [thread:$0]  %s364_s4, 32, %s848_s7, [#allocation4], %s682_s25, %s682_s25, %s683_s26  }
 0x2f9   :  { %676 = dma.done.wait [#allocation4], 128  }
 0x2fa   :  { %677 = vsyncadd [#allocation4], 4294967168 }
 0x2fb   :  { %373 = vsyncpa [#allocation3], 1 }
 0x2fc   :  { %374 = vsyncpa [#allocation6], 1 }
 0x2fd   :  { %375 = vsyncpa [#allocation9], 1 }
 0x2fe   :  { %376 = vsyncpa [#allocation4], 1 }

</bundles_post_ra>
